<compile_context>
chip_gen: v7x
topology: tpu7x:2x2x1
jax: 0.10.0
libtpu: 0.0.40
codegen_flags: <defaults>
</compile_context>

<pallas_src>
import jax
import jax.numpy as jnp
from jax import lax
from jax.experimental import pallas as pl
from jax.experimental.pallas import tpu as pltpu


def _round_up(x, m):
    return (x + m - 1) // m * m


def _pick_tile(n, preferred):
    """Largest multiple of 128 that divides n, capped at `preferred`."""
    t = min(preferred, n)
    while n % t != 0:
        t -= 128
    return max(t, 128)


# ---------------------------------------------------------------------------
# Stage 1: Z = norm_dst * ((A @ (norm_src * X)) @ W) + b
# Grid: (row tiles of A : parallel, src/K tiles : arbitrary reduction).
# If in_feats > n_hidden (padded), the wrapper pre-projects X@W and the kernel
# skips the weight matmul (aggregate-only path).
# ---------------------------------------------------------------------------
def _make_z_kernel(apply_weight):
    def z_kernel(*refs):
        if apply_weight:
            a_ref, feat_ref, w_ref, b_ref, nd_ref, z_ref, acc_ref = refs
        else:
            a_ref, feat_ref, b_ref, nd_ref, z_ref, acc_ref = refs

        k = pl.program_id(1)

        @pl.when(k == 0)
        def _init():
            acc_ref[...] = jnp.zeros_like(acc_ref)

        acc_ref[...] += jnp.dot(a_ref[...], feat_ref[...],
                                preferred_element_type=jnp.float32)

        @pl.when(k == pl.num_programs(1) - 1)
        def _finalize():
            h = acc_ref[...]
            if apply_weight:
                h = jnp.dot(h, w_ref[...], preferred_element_type=jnp.float32)
            z_ref[...] = nd_ref[...] * h + b_ref[...]

    return z_kernel


# ---------------------------------------------------------------------------
# Stage 2: adj_rec = Z @ Z^T, tiled over (i, j) output tiles.
# Contraction on the last dim of both operands -> no explicit transpose of Z.
# ---------------------------------------------------------------------------
def _decoder_kernel(zi_ref, zj_ref, adj_ref):
    adj_ref[...] = lax.dot_general(
        zi_ref[...], zj_ref[...],
        dimension_numbers=(((1,), (1,)), ((), ())),
        preferred_element_type=jnp.float32)


@jax.jit
def gae_forward(adj, feats, weight, bias):
    f32 = jnp.float32
    adj = adj.astype(f32)
    feats = feats.astype(f32)
    weight = weight.astype(f32)
    bias = jnp.reshape(bias, (1, -1)).astype(f32)

    N = adj.shape[0]
    F_in = feats.shape[1]
    H = weight.shape[1]

    Np = _round_up(N, 128)
    Fp = _round_up(F_in, 128)
    Hp = _round_up(H, 128)

    # Hoisted prep (tiny vs. the N^2 matmuls): degrees, norm vectors, and the
    # src-side normalization folded into the feature rows.
    deg_src = jnp.sum(adj, axis=0)
    deg_dst = jnp.sum(adj, axis=1)
    norm_src = jnp.where(deg_src > 0.0, lax.rsqrt(deg_src), 0.0)
    norm_dst = jnp.where(deg_dst > 0.0, lax.rsqrt(deg_dst), 0.0)
    xs = feats * norm_src[:, None]                          # [N, F]

    a_p = jnp.zeros((Np, Np), f32).at[:N, :N].set(adj)
    nd_p = jnp.zeros((Np, 1), f32).at[:N, 0].set(norm_dst)
    b_p = jnp.zeros((1, Hp), f32).at[:, :H].set(bias)

    # Keep the cheaper contraction width on the A-side matmul.
    apply_weight = Fp <= Hp
    if apply_weight:
        feat_p = jnp.zeros((Np, Fp), f32).at[:N, :F_in].set(xs)
        w_p = jnp.zeros((Fp, Hp), f32).at[:F_in, :H].set(weight)
        d_feat = Fp
    else:
        y = xs @ weight                                     # [N, H], cheap pre-projection
        feat_p = jnp.zeros((Np, Hp), f32).at[:N, :H].set(y)
        d_feat = Hp

    # -------------------- stage 1: Z --------------------
    tm = _pick_tile(Np, 256)
    tk = _pick_tile(Np, 512)

    in_specs = [
        pl.BlockSpec((tm, tk), lambda i, k: (i, k)),        # A row/col tile
        pl.BlockSpec((tk, d_feat), lambda i, k: (k, 0)),    # scaled features
    ]
    args = [a_p, feat_p]
    if apply_weight:
        in_specs.append(pl.BlockSpec((Fp, Hp), lambda i, k: (0, 0)))  # W (resident)
        args.append(w_p)
    in_specs += [
        pl.BlockSpec((1, Hp), lambda i, k: (0, 0)),         # bias
        pl.BlockSpec((tm, 1), lambda i, k: (i, 0)),         # norm_dst column
    ]
    args += [b_p, nd_p]

    z_p = pl.pallas_call(
        _make_z_kernel(apply_weight),
        out_shape=jax.ShapeDtypeStruct((Np, Hp), f32),
        grid_spec=pltpu.PrefetchScalarGridSpec(
            num_scalar_prefetch=0,
            grid=(Np // tm, Np // tk),
            in_specs=in_specs,
            out_specs=pl.BlockSpec((tm, Hp), lambda i, k: (i, 0)),
            scratch_shapes=[pltpu.VMEM((tm, d_feat), f32)],
        ),
        compiler_params=pltpu.CompilerParams(
            dimension_semantics=("parallel", "arbitrary"),
            vmem_limit_bytes=32 * 1024 * 1024,
        ),
    )(*args)

    # -------------------- stage 2: adj_rec = Z @ Z^T --------------------
    tm2 = _pick_tile(Np, 512)
    tn2 = _pick_tile(Np, 512)

    adj_p = pl.pallas_call(
        _decoder_kernel,
        out_shape=jax.ShapeDtypeStruct((Np, Np), f32),
        grid_spec=pltpu.PrefetchScalarGridSpec(
            num_scalar_prefetch=0,
            grid=(Np // tm2, Np // tn2),
            in_specs=[
                pl.BlockSpec((tm2, Hp), lambda i, j: (i, 0)),
                pl.BlockSpec((tn2, Hp), lambda i, j: (j, 0)),
            ],
            out_specs=pl.BlockSpec((tm2, tn2), lambda i, j: (i, j)),
        ),
        compiler_params=pltpu.CompilerParams(
            dimension_semantics=("parallel", "parallel"),
            vmem_limit_bytes=32 * 1024 * 1024,
        ),
    )(z_p, z_p)

    return adj_p[:N, :N], z_p[:N, :H]


def gae_reference(adj, feats, weight, bias):
    deg_src = jnp.sum(adj, axis=0, keepdims=True)
    deg_dst = jnp.sum(adj, axis=1, keepdims=True)
    norm_src = jnp.where(deg_src > 0.0, deg_src ** -0.5, 0.0)
    norm_dst = jnp.where(deg_dst > 0.0, deg_dst ** -0.5, 0.0)
    a_norm = norm_dst * adj * norm_src
    z = (a_norm @ feats) @ weight + bias
    return z @ z.T, z


if __name__ == "__main__":
    key = jax.random.PRNGKey(0)
    k_adj, k_x, k_w, k_b = jax.random.split(key, 4)

    N, in_feats, n_hidden = 64, 16, 32

    # Random symmetric adjacency with self-loops (dense, float32)
    a_rand = jax.random.bernoulli(k_adj, p=0.2, shape=(N, N)).astype(jnp.float32)
    adj = jnp.clip(a_rand + a_rand.T + jnp.eye(N, dtype=jnp.float32), 0.0, 1.0)

    feats = jax.random.normal(k_x, (N, in_feats), dtype=jnp.float32)

    # Deterministic synthetic GraphConv parameters (Glorot-ish scale)
    weight = jax.random.normal(k_w, (in_feats, n_hidden), dtype=jnp.float32) * 0.1
    bias = jax.random.normal(k_b, (1, n_hidden), dtype=jnp.float32) * 0.01

    adj_rec, z = gae_forward(adj, feats, weight, bias)
    jax.block_until_ready((adj_rec, z))

    adj_ref, z_ref = gae_reference(adj, feats, weight, bias)
    assert jnp.allclose(z, z_ref, atol=1e-4, rtol=1e-4), \
        f"Z mismatch, max abs err = {jnp.max(jnp.abs(z - z_ref))}"
    assert jnp.allclose(adj_rec, adj_ref, atol=1e-4, rtol=1e-4), \
        f"adj_rec mismatch, max abs err = {jnp.max(jnp.abs(adj_rec - adj_ref))}"

    print("KERNEL_OK")
</pallas_src>

<mosaic_0001>
module attributes {stable_mosaic.version = 11 : i64} {
  func.func @_decoder_kernel(%arg0: i32, %arg1: i32, %arg2: memref<128x128xf32, #tpu.memory_space<vmem>>, %arg3: memref<128x128xf32, #tpu.memory_space<vmem>>, %arg4: memref<128x128xf32, #tpu.memory_space<vmem>>) attributes {dimension_semantics = [#tpu.dimension_semantics<parallel>, #tpu.dimension_semantics<parallel>], iteration_bounds = array<i64: 1, 1>, scalar_prefetch = 0 : i64, scratch_operands = 0 : i64, tpu.core_type = #tpu.core_type<tc>, window_params = [{transform_indices = @transform_0, window_bounds = array<i64: 128, 128>}, {transform_indices = @transform_1, window_bounds = array<i64: 128, 128>}, {transform_indices = @transform_2, window_bounds = array<i64: 128, 128>}]} {
    %c0 = arith.constant 0 : index
    %c0_0 = arith.constant 0 : index
    %0 = vector.load %arg2[%c0, %c0_0] : memref<128x128xf32, #tpu.memory_space<vmem>>, vector<128x128xf32>
    %c0_1 = arith.constant 0 : index
    %c0_2 = arith.constant 0 : index
    %1 = vector.load %arg3[%c0_1, %c0_2] : memref<128x128xf32, #tpu.memory_space<vmem>>, vector<128x128xf32>
    %cst = arith.constant dense<0.000000e+00> : vector<128x128xf32>
    %2 = tpu.matmul %0, %1, %cst {dimension_numbers = #tpu.dot_dimension_numbers<[1], [1], [0], [0], [0, 0, 1, 0], [], []>} : vector<128x128xf32>, vector<128x128xf32>, vector<128x128xf32> -> vector<128x128xf32>
    %c0_3 = arith.constant 0 : index
    %c0_4 = arith.constant 0 : index
    %3 = vector.load %arg4[%c0_3, %c0_4] : memref<128x128xf32, #tpu.memory_space<vmem>>, vector<128x128xf32>
    tpu.vector_store %arg4[%c0_3, %c0_4], %2 {strides = array<i32>} : memref<128x128xf32, #tpu.memory_space<vmem>>, vector<128x128xf32>,
    return
  }
  func.func @transform_0(%arg0: i32, %arg1: i32) -> (i32, i32) {
    %c0_i32 = arith.constant 0 : i32
    %c0_i32_0 = arith.constant 0 : i32
    return %arg0, %c0_i32 : i32, i32
  }
  func.func @transform_1(%arg0: i32, %arg1: i32) -> (i32, i32) {
    %c0_i32 = arith.constant 0 : i32
    %c0_i32_0 = arith.constant 0 : i32
    return %arg1, %c0_i32 : i32, i32
  }
  func.func @transform_2(%arg0: i32, %arg1: i32) -> (i32, i32) {
    %c0_i32 = arith.constant 0 : i32
    return %arg0, %arg1 : i32, i32
  }
}

module attributes {stable_mosaic.version = 11 : i64} {
  func.func @z_kernel(%arg0: i32, %arg1: i32, %arg2: memref<128x128xf32, #tpu.memory_space<vmem>>, %arg3: memref<128x128xf32, #tpu.memory_space<vmem>>, %arg4: memref<128x128xf32, #tpu.memory_space<vmem>>, %arg5: memref<1x128xf32, #tpu.memory_space<vmem>>, %arg6: memref<128x1xf32, #tpu.memory_space<vmem>>, %arg7: memref<128x128xf32, #tpu.memory_space<vmem>>, %arg8: memref<128x128xf32, #tpu.memory_space<vmem>>) attributes {dimension_semantics = [#tpu.dimension_semantics<parallel>, #tpu.dimension_semantics<arbitrary>], iteration_bounds = array<i64: 1, 1>, scalar_prefetch = 0 : i64, scratch_operands = 1 : i64, tpu.core_type = #tpu.core_type<tc>, window_params = [{transform_indices = @transform_0, window_bounds = array<i64: 128, 128>}, {transform_indices = @transform_1, window_bounds = array<i64: 128, 128>}, {pipeline_mode = #tpu.pipeline_mode<synchronous>, transform_indices = @transform_2, window_bounds = array<i64: 128, 128>}, {pipeline_mode = #tpu.pipeline_mode<synchronous>, transform_indices = @transform_3, window_bounds = array<i64: 1, 128>}, {transform_indices = @transform_4, window_bounds = array<i64: 128, 1>}, {transform_indices = @transform_5, window_bounds = array<i64: 128, 128>}]} {
    %c0_i32 = arith.constant 0 : i32
    %0 = arith.cmpi eq, %arg1, %c0_i32 : i32
    %1 = arith.extui %0 : i1 to i32
    %c0_i32_0 = arith.constant 0 : i32
    %2 = arith.cmpi ne, %1, %c0_i32_0 : i32
    scf.if %2 {
      %cst_10 = arith.constant 0.000000e+00 : f32
      %12 = vector.broadcast %cst_10 : f32 to vector<128x128xf32>
      %c0_11 = arith.constant 0 : index
      %c0_12 = arith.constant 0 : index
      %13 = vector.load %arg8[%c0_11, %c0_12] : memref<128x128xf32, #tpu.memory_space<vmem>>, vector<128x128xf32>
      tpu.vector_store %arg8[%c0_11, %c0_12], %12 {strides = array<i32>} : memref<128x128xf32, #tpu.memory_space<vmem>>, vector<128x128xf32>,
    } else {
    }
    %c0 = arith.constant 0 : index
    %c0_1 = arith.constant 0 : index
    %3 = vector.load %arg8[%c0, %c0_1] : memref<128x128xf32, #tpu.memory_space<vmem>>, vector<128x128xf32>
    %c0_2 = arith.constant 0 : index
    %c0_3 = arith.constant 0 : index
    %4 = vector.load %arg2[%c0_2, %c0_3] : memref<128x128xf32, #tpu.memory_space<vmem>>, vector<128x128xf32>
    %c0_4 = arith.constant 0 : index
    %c0_5 = arith.constant 0 : index
    %5 = vector.load %arg3[%c0_4, %c0_5] : memref<128x128xf32, #tpu.memory_space<vmem>>, vector<128x128xf32>
    %cst = arith.constant dense<0.000000e+00> : vector<128x128xf32>
    %6 = tpu.matmul %4, %5, %cst {dimension_numbers = #tpu.dot_dimension_numbers<[1], [0], [0], [1], [0, 0, 1, 1], [], []>} : vector<128x128xf32>, vector<128x128xf32>, vector<128x128xf32> -> vector<128x128xf32>
    %7 = arith.addf %3, %6 : vector<128x128xf32>
    %c0_6 = arith.constant 0 : index
    %c0_7 = arith.constant 0 : index
    %8 = vector.load %arg8[%c0_6, %c0_7] : memref<128x128xf32, #tpu.memory_space<vmem>>, vector<128x128xf32>
    tpu.vector_store %arg8[%c0_6, %c0_7], %7 {strides = array<i32>} : memref<128x128xf32, #tpu.memory_space<vmem>>, vector<128x128xf32>,
    %c0_i32_8 = arith.constant 0 : i32
    %9 = arith.cmpi eq, %arg1, %c0_i32_8 : i32
    %10 = arith.extui %9 : i1 to i32
    %c0_i32_9 = arith.constant 0 : i32
    %11 = arith.cmpi ne, %10, %c0_i32_9 : i32
    scf.if %11 {
      %c0_10 = arith.constant 0 : index
      %c0_11 = arith.constant 0 : index
      %12 = vector.load %arg8[%c0_10, %c0_11] : memref<128x128xf32, #tpu.memory_space<vmem>>, vector<128x128xf32>
      %c0_12 = arith.constant 0 : index
      %c0_13 = arith.constant 0 : index
      %13 = vector.load %arg4[%c0_12, %c0_13] : memref<128x128xf32, #tpu.memory_space<vmem>>, vector<128x128xf32>
      %cst_14 = arith.constant dense<0.000000e+00> : vector<128x128xf32>
      %14 = tpu.matmul %12, %13, %cst_14 {dimension_numbers = #tpu.dot_dimension_numbers<[1], [0], [0], [1], [0, 0, 1, 1], [], []>} : vector<128x128xf32>, vector<128x128xf32>, vector<128x128xf32> -> vector<128x128xf32>
      %c0_15 = arith.constant 0 : index
      %c0_16 = arith.constant 0 : index
      %15 = vector.load %arg6[%c0_15, %c0_16] : memref<128x1xf32, #tpu.memory_space<vmem>>, vector<128x1xf32>
      %16 = vector.broadcast %15 : vector<128x1xf32> to vector<128x128xf32>
      %17 = arith.mulf %16, %14 : vector<128x128xf32>
      %c0_17 = arith.constant 0 : index
      %c0_18 = arith.constant 0 : index
      %18 = vector.load %arg5[%c0_17, %c0_18] : memref<1x128xf32, #tpu.memory_space<vmem>>, vector<1x128xf32>
      %19 = vector.broadcast %18 : vector<1x128xf32> to vector<128x128xf32>
      %20 = arith.addf %17, %19 : vector<128x128xf32>
      %c0_19 = arith.constant 0 : index
      %c0_20 = arith.constant 0 : index
      %21 = vector.load %arg7[%c0_19, %c0_20] : memref<128x128xf32, #tpu.memory_space<vmem>>, vector<128x128xf32>
      tpu.vector_store %arg7[%c0_19, %c0_20], %20 {strides = array<i32>} : memref<128x128xf32, #tpu.memory_space<vmem>>, vector<128x128xf32>,
    } else {
    }
    return
  }
  func.func @transform_0(%arg0: i32, %arg1: i32) -> (i32, i32) {
    %c0_i32 = arith.constant 0 : i32
    return %arg0, %arg1 : i32, i32
  }
  func.func @transform_1(%arg0: i32, %arg1: i32) -> (i32, i32) {
    %c0_i32 = arith.constant 0 : i32
    %c0_i32_0 = arith.constant 0 : i32
    return %arg1, %c0_i32 : i32, i32
  }
  func.func @transform_2(%arg0: i32, %arg1: i32) -> (i32, i32) {
    %c0_i32 = arith.constant 0 : i32
    %c0_i32_0 = arith.constant 0 : i32
    %c0_i32_1 = arith.constant 0 : i32
    return %c0_i32, %c0_i32_0 : i32, i32
  }
  func.func @transform_3(%arg0: i32, %arg1: i32) -> (i32, i32) {
    %c0_i32 = arith.constant 0 : i32
    %c0_i32_0 = arith.constant 0 : i32
    %c0_i32_1 = arith.constant 0 : i32
    return %c0_i32, %c0_i32_0 : i32, i32
  }
  func.func @transform_4(%arg0: i32, %arg1: i32) -> (i32, i32) {
    %c0_i32 = arith.constant 0 : i32
    %c0_i32_0 = arith.constant 0 : i32
    return %arg0, %c0_i32 : i32, i32
  }
  func.func @transform_5(%arg0: i32, %arg1: i32) -> (i32, i32) {
    %c0_i32 = arith.constant 0 : i32
    %c0_i32_0 = arith.constant 0 : i32
    return %arg0, %c0_i32 : i32, i32
  }
}

</mosaic_0001>

<bundles_post_ra>
// kernel: gae_forward.3
= control target key start
LH: loop header
LB: loop body
LE: loop exit
PB: predicated region body
PF: predicated region fallthrough
CT: control target
= control target key end

     0   :  { %s503_s1 = inlined_call_operand.vmem [shape: f32[128,128], index: 1, kind: input, shape index: {}, may-alias: {0,1}]   ;;  %s504_s0 = inlined_call_operand.vmem [shape: f32[128,128], index: 0, kind: input, shape index: {}, may-alias: {0,1}]   ;;  %s505_s2 = inlined_call_operand.vmem [shape: f32[128,128], index: 2, kind: output, shape index: {}]  }
   0x1   :  { %v27_v0 = vld [vmem:[%s503_s1] sm:$0xff]  ;;  %v28_v1 = vld [vmem:[%s503_s1 + $0x8] sm:$0xff]  ;;  %v29_v2 = vld [vmem:[%s503_s1 + $0x10] sm:$0xff] }
   0x2   :  { %v296_v3 = vpack.c.bf16 %v28_v1, %v27_v0  ;;  %v30_v4 = vld [vmem:[%s503_s1 + $0x18] sm:$0xff]  ;;  %v11_v6 = vld [vmem:[%s504_s0] sm:$0xff]  ;;  %v32_v9 = vld [vmem:[%s503_s1 + $0x28] sm:$0xff] }
   0x3   :  { %v300_v5 = vpack.c.bf16 %v30_v4, %v29_v2  ;;  %v19_v7 = vld [vmem:[%s504_s0 + $0x40] sm:$0xff]  ;;  %272 = vmatprep.mubr.f32.mxu0 %v11_v6  ;;  %v33_v11 = vld [vmem:[%s503_s1 + $0x30] sm:$0xff]  ;;  %v34_v12 = vld [vmem:[%s503_s1 + $0x38] sm:$0xff] }
   0x4   :  { %297 = vmatprep.subr.bf16.mxu0 %v296_v3  ;;  %328 = vmatprep.subr.bf16.mxu1 %v296_v3  ;;  %v31_v8 = vld [vmem:[%s503_s1 + $0x20] sm:$0xff]  ;;  %v308_v13 = vpack.c.bf16 %v34_v12, %v33_v11  ;;  %v36_v15 = vld [vmem:[%s503_s1 + $0x48] sm:$0xff]  ;;  %v37_v17 = vld [vmem:[%s503_s1 + $0x50] sm:$0xff] }
   0x5   :  { %299 = vmatpush3.bf16.xpose.msra.mxu0 %v296_v3  ;;  %336 = vmatpush3.bf16.xpose.msra.mxu1 %v296_v3  ;;  %v304_v10 = vpack.c.bf16 %v32_v9, %v31_v8  ;;  %v35_v14 = vld [vmem:[%s503_s1 + $0x40] sm:$0xff]  ;;  %v38_v18 = vld [vmem:[%s503_s1 + $0x58] sm:$0xff]  ;;  %v40_v21 = vld [vmem:[%s503_s1 + $0x68] sm:$0xff] }
   0x6   :  { %301 = vmatprep.subr.bf16.mxu0 %v300_v5  ;;  %329 = vmatprep.subr.bf16.mxu1 %v300_v5  ;;  %v312_v16 = vpack.c.bf16 %v36_v15, %v35_v14  ;;  %v316_v19 = vpack.c.bf16 %v38_v18, %v37_v17  ;;  %v39_v20 = vld [vmem:[%s503_s1 + $0x60] sm:$0xff]  ;;  %v41_v23 = vld [vmem:[%s503_s1 + $0x70] sm:$0xff]  ;;  %v42_v24 = vld [vmem:[%s503_s1 + $0x78] sm:$0xff] }
   0x7   :  { %284 = vmatprep.mubr.f32.mxu1 %v19_v7  ;;  %v320_v22 = vpack.c.bf16 %v40_v21, %v39_v20  ;;  %v324_v25 = vpack.c.bf16 %v42_v24, %v41_v23  ;;  %v12_v26 = vld [vmem:[%s504_s0 + $0x8] sm:$0xff]  ;;  %v13_v28 = vld [vmem:[%s504_s0 + $0x10] sm:$0xff]  ;;  %v14_v30 = vld [vmem:[%s504_s0 + $0x18] sm:$0xff] }
   0x8   :  { %v20_v27 = vld [vmem:[%s504_s0 + $0x48] sm:$0xff]  ;;  %v21_v29 = vld [vmem:[%s504_s0 + $0x50] sm:$0xff]  ;;  %v22_v31 = vld [vmem:[%s504_s0 + $0x58] sm:$0xff] }
   0x9   :  { %v15_v32 = vld [vmem:[%s504_s0 + $0x20] sm:$0xff]  ;;  %v16_v34 = vld [vmem:[%s504_s0 + $0x28] sm:$0xff]  ;;  %v17_v36 = vld [vmem:[%s504_s0 + $0x30] sm:$0xff] }
   0xa   :  { %v23_v33 = vld [vmem:[%s504_s0 + $0x60] sm:$0xff]  ;;  %v24_v35 = vld [vmem:[%s504_s0 + $0x68] sm:$0xff]  ;;  %v25_v37 = vld [vmem:[%s504_s0 + $0x70] sm:$0xff] }
   0xb   :  { %v18_v38 = vld [vmem:[%s504_s0 + $0x38] sm:$0xff] }
   0xc   :  { %v26_v39 = vld [vmem:[%s504_s0 + $0x78] sm:$0xff] }
   0xd   :  { %303 = vmatpush3.bf16.xpose.msra.mxu0 %v300_v5  ;;  %337 = vmatpush3.bf16.xpose.msra.mxu1 %v300_v5 }
   0xe   :  { %305 = vmatprep.subr.bf16.mxu0 %v304_v10  ;;  %330 = vmatprep.subr.bf16.mxu1 %v304_v10 }
  0x15   :  { %307 = vmatpush3.bf16.xpose.msra.mxu0 %v304_v10  ;;  %338 = vmatpush3.bf16.xpose.msra.mxu1 %v304_v10 }
  0x16   :  { %309 = vmatprep.subr.bf16.mxu0 %v308_v13  ;;  %331 = vmatprep.subr.bf16.mxu1 %v308_v13 }
  0x1d   :  { %311 = vmatpush3.bf16.xpose.msra.mxu0 %v308_v13  ;;  %339 = vmatpush3.bf16.xpose.msra.mxu1 %v308_v13 }
  0x1e   :  { %313 = vmatprep.subr.bf16.mxu0 %v312_v16  ;;  %332 = vmatprep.subr.bf16.mxu1 %v312_v16 }
  0x25   :  { %315 = vmatpush3.bf16.xpose.msra.mxu0 %v312_v16  ;;  %340 = vmatpush3.bf16.xpose.msra.mxu1 %v312_v16 }
  0x26   :  { %317 = vmatprep.subr.bf16.mxu0 %v316_v19  ;;  %333 = vmatprep.subr.bf16.mxu1 %v316_v19 }
  0x2d   :  { %319 = vmatpush3.bf16.xpose.msra.mxu0 %v316_v19  ;;  %341 = vmatpush3.bf16.xpose.msra.mxu1 %v316_v19 }
  0x2e   :  { %321 = vmatprep.subr.bf16.mxu0 %v320_v22  ;;  %334 = vmatprep.subr.bf16.mxu1 %v320_v22 }
  0x35   :  { %323 = vmatpush3.bf16.xpose.msra.mxu0 %v320_v22  ;;  %342 = vmatpush3.bf16.xpose.msra.mxu1 %v320_v22 }
  0x36   :  { %325 = vmatprep.subr.bf16.mxu0 %v324_v25  ;;  %335 = vmatprep.subr.bf16.mxu1 %v324_v25 }
  0x3d   :  { %327 = vmatpush3.bf16.xpose.msra.mxu0 %v324_v25  ;;  %343 = vmatpush3.bf16.xpose.msra.mxu1 %v324_v25 }
  0x44   :  { %273 = vmatmul.mubr.f32.vlgmr.msra.gmra.mrb[0].mxu0 %v12_v26  ;;  %285 = vmatmul.mubr.f32.vlgmr.msra.gmra.mrb[0].mxu1 %v20_v27 }
  0x45   :  { %275 = vmatprep.mubr.f32.mxu0 %v13_v28  ;;  %287 = vmatprep.mubr.f32.mxu1 %v21_v29 }
  0x48   :  { %276 = vmatmul.mubr.f32.gmra.mrb[2].mxu0 %v14_v30  ;;  %288 = vmatmul.mubr.f32.gmra.mrb[2].mxu1 %v22_v31 }
  0x49   :  { %278 = vmatprep.mubr.f32.mxu0 %v15_v32  ;;  %290 = vmatprep.mubr.f32.mxu1 %v23_v33 }
  0x4c   :  { %279 = vmatmul.mubr.f32.gmra.mrb[4].mxu0 %v16_v34  ;;  %291 = vmatmul.mubr.f32.gmra.mrb[4].mxu1 %v24_v35 }
  0x4d   :  { %281 = vmatprep.mubr.f32.mxu0 %v17_v36  ;;  %293 = vmatprep.mubr.f32.mxu1 %v25_v37 }
  0x50   :  { %282 = vmatmul.mubr.f32.gmra.mrb[6].mxu0 %v18_v38  ;;  %294 = vmatmul.mubr.f32.gmra.mrb[6].mxu1 %v26_v39 }
 0x117   :  { %v274_v40 = vpop.f32.mrb[0].mxu0  ;;  %v286_v41 = vpop.f32.mrb[0].mxu1 }
 0x118   :  { %189 = vst [vmem:[%s505_s2 + $0x8] sm:$0xff] %v274_v40  ;;  %197 = vst [vmem:[%s505_s2 + $0x48] sm:$0xff] %v286_v41  ;;  %v109_v42 = vpop.f32.mrb[1].mxu0  ;;  %v149_v43 = vpop.f32.mrb[1].mxu1 }
 0x119   :  { %188 = vst [vmem:[%s505_s2] sm:$0xff] %v109_v42  ;;  %196 = vst [vmem:[%s505_s2 + $0x40] sm:$0xff] %v149_v43 }
 0x11b   :  { %v277_v44 = vpop.f32.mrb[2].mxu0  ;;  %v289_v45 = vpop.f32.mrb[2].mxu1 }
 0x11c   :  { %191 = vst [vmem:[%s505_s2 + $0x18] sm:$0xff] %v277_v44  ;;  %199 = vst [vmem:[%s505_s2 + $0x58] sm:$0xff] %v289_v45  ;;  %v119_v46 = vpop.f32.mrb[3].mxu0  ;;  %v159_v47 = vpop.f32.mrb[3].mxu1 }
 0x11d   :  { %190 = vst [vmem:[%s505_s2 + $0x10] sm:$0xff] %v119_v46  ;;  %198 = vst [vmem:[%s505_s2 + $0x50] sm:$0xff] %v159_v47 }
 0x11f   :  { %v280_v48 = vpop.f32.mrb[4].mxu0  ;;  %v292_v49 = vpop.f32.mrb[4].mxu1 }
 0x120   :  { %193 = vst [vmem:[%s505_s2 + $0x28] sm:$0xff] %v280_v48  ;;  %201 = vst [vmem:[%s505_s2 + $0x68] sm:$0xff] %v292_v49  ;;  %v129_v50 = vpop.f32.mrb[5].mxu0  ;;  %v169_v51 = vpop.f32.mrb[5].mxu1 }
 0x121   :  { %192 = vst [vmem:[%s505_s2 + $0x20] sm:$0xff] %v129_v50  ;;  %200 = vst [vmem:[%s505_s2 + $0x60] sm:$0xff] %v169_v51 }
 0x123   :  { %v283_v52 = vpop.f32.mrb[6].mxu0  ;;  %v295_v53 = vpop.f32.mrb[6].mxu1 }
 0x124   :  { %195 = vst [vmem:[%s505_s2 + $0x38] sm:$0xff] %v283_v52  ;;  %203 = vst [vmem:[%s505_s2 + $0x78] sm:$0xff] %v295_v53  ;;  %v139_v54 = vpop.f32.mrb[7].mxu0  ;;  %v179_v55 = vpop.f32.mrb[7].mxu1 }
 0x125   :  { %194 = vst [vmem:[%s505_s2 + $0x30] sm:$0xff] %v139_v54  ;;  %202 = vst [vmem:[%s505_s2 + $0x70] sm:$0xff] %v179_v55 }

// kernel: gae_forward.2
= control target key start
LH: loop header
LB: loop body
LE: loop exit
PB: predicated region body
PF: predicated region fallthrough
CT: control target
= control target key end

     0   :  { %s1136_s1 = inlined_call_operand.vmem [shape: f32[128,128], index: 1, kind: input, shape index: {}]   ;;  %s1137_s0 = inlined_call_operand.vmem [shape: f32[128,128], index: 0, kind: input, shape index: {}]   ;;  %s1138_s2 = inlined_call_operand.vmem [shape: f32[128,128], index: 2, kind: input, shape index: {}]   ;;  %s1139_s4 = inlined_call_operand.vmem [shape: f32[128,1], index: 4, kind: input, shape index: {}]   ;;  %s1140_s3 = inlined_call_operand.vmem [shape: f32[1,128], index: 3, kind: input, shape index: {}]   ;;  %s1141_s5 = inlined_call_operand.vmem [shape: f32[128,128], index: 5, kind: output, shape index: {}]  }
   0x1   :  { %v72_v0 = vld [vmem:[%s1136_s1] sm:$0xff]  ;;  %v73_v1 = vld [vmem:[%s1136_s1 + $0x8] sm:$0xff]  ;;  %v74_v2 = vld [vmem:[%s1136_s1 + $0x10] sm:$0xff] }
   0x2   :  { %v777_v3 = vpack.c.bf16 %v73_v1, %v72_v0  ;;  %v75_v4 = vld [vmem:[%s1136_s1 + $0x18] sm:$0xff]  ;;  %v76_v6 = vld [vmem:[%s1136_s1 + $0x20] sm:$0xff]  ;;  %v77_v7 = vld [vmem:[%s1136_s1 + $0x28] sm:$0xff]  ;;  %v844_v0 = vmov 0  }
   0x3   :  { %v781_v5 = vpack.c.bf16 %v75_v4, %v74_v2  ;;  %v785_v8 = vpack.c.bf16 %v77_v7, %v76_v6  ;;  %v56_v9 = vld [vmem:[%s1137_s0] sm:$0xff]  ;;  %v78_v10 = vld [vmem:[%s1136_s1 + $0x30] sm:$0xff]  ;;  %v79_v11 = vld [vmem:[%s1136_s1 + $0x38] sm:$0xff]  ;;  %843 = vset.pattern.permute.xlu1 %v844_v0  ;;  %842 = vset.pattern.permute.xlu0 %v844_v0 }
   0x4   :  { %778 = vmatprep.subr.bf16.mxu0 %v777_v3  ;;  %697 = vmatprep.mubr.f32.mxu0 %v56_v9  ;;  %v789_v12 = vpack.c.bf16 %v79_v11, %v78_v10  ;;  %v80_v13 = vld [vmem:[%s1136_s1 + $0x40] sm:$0xff]  ;;  %v81_v14 = vld [vmem:[%s1136_s1 + $0x48] sm:$0xff]  ;;  %v286_v17 = vld [vmem:[%s1138_s2 + $0x10] sm:$0xff] }
   0x5   :  { %780 = vmatpush3.bf16.msra.mxu0 %v777_v3  ;;  %v284_v15 = vld [vmem:[%s1138_s2] sm:$0xff]  ;;  %v285_v16 = vld [vmem:[%s1138_s2 + $0x8] sm:$0xff]  ;;  %v287_v18 = vld [vmem:[%s1138_s2 + $0x18] sm:$0xff]  ;;  %v793_v21 = vpack.c.bf16 %v81_v14, %v80_v13 }
   0x6   :  { %782 = vmatprep.subr.bf16.mxu0 %v781_v5  ;;  %v809_v19 = vpack.c.bf16 %v285_v16, %v284_v15  ;;  %v813_v20 = vpack.c.bf16 %v287_v18, %v286_v17  ;;  %v288_v22 = vld [vmem:[%s1138_s2 + $0x20] sm:$0xff]  ;;  %v289_v23 = vld [vmem:[%s1138_s2 + $0x28] sm:$0xff]  ;;  %v82_v24 = vld [vmem:[%s1136_s1 + $0x50] sm:$0xff] }
   0x7   :  { %v83_v25 = vld [vmem:[%s1136_s1 + $0x58] sm:$0xff]  ;;  %v817_v26 = vpack.c.bf16 %v289_v23, %v288_v22  ;;  %v290_v28 = vld [vmem:[%s1138_s2 + $0x30] sm:$0xff]  ;;  %v84_v30 = vld [vmem:[%s1136_s1 + $0x60] sm:$0xff] }
   0x8   :  { %810 = vmatprep.subr.bf16.mxu1 %v809_v19  ;;  %v797_v27 = vpack.c.bf16 %v83_v25, %v82_v24  ;;  %v291_v29 = vld [vmem:[%s1138_s2 + $0x38] sm:$0xff]  ;;  %v85_v31 = vld [vmem:[%s1136_s1 + $0x68] sm:$0xff]  ;;  %v292_v34 = vld [vmem:[%s1138_s2 + $0x40] sm:$0xff] }
   0x9   :  { %784 = vmatpush3.bf16.msra.mxu0 %v781_v5  ;;  %812 = vmatpush3.bf16.msra.mxu1 %v809_v19  ;;  %v821_v32 = vpack.c.bf16 %v291_v29, %v290_v28  ;;  %v801_v33 = vpack.c.bf16 %v85_v31, %v84_v30  ;;  %v293_v35 = vld [vmem:[%s1138_s2 + $0x48] sm:$0xff]  ;;  %v86_v36 = vld [vmem:[%s1136_s1 + $0x70] sm:$0xff]  ;;  %v87_v37 = vld [vmem:[%s1136_s1 + $0x78] sm:$0xff] }
   0xa   :  { %786 = vmatprep.subr.bf16.mxu0 %v785_v8  ;;  %814 = vmatprep.subr.bf16.mxu1 %v813_v20  ;;  %v825_v38 = vpack.c.bf16 %v293_v35, %v292_v34  ;;  %v805_v39 = vpack.c.bf16 %v87_v37, %v86_v36  ;;  %v294_v40 = vld [vmem:[%s1138_s2 + $0x50] sm:$0xff]  ;;  %v295_v41 = vld [vmem:[%s1138_s2 + $0x58] sm:$0xff]  ;;  %v296_v43 = vld [vmem:[%s1138_s2 + $0x60] sm:$0xff] }
   0xb   :  { %v829_v42 = vpack.c.bf16 %v295_v41, %v294_v40  ;;  %v297_v44 = vld [vmem:[%s1138_s2 + $0x68] sm:$0xff]  ;;  %v58_v47 = vld [vmem:[%s1137_s0 + $0x10] sm:$0xff]  ;;  %v299_v49 = vld [vmem:[%s1138_s2 + $0x78] sm:$0xff] }
   0xc   :  { %v57_v45 = vld [vmem:[%s1137_s0 + $0x8] sm:$0xff]  ;;  %v833_v46 = vpack.c.bf16 %v297_v44, %v296_v43  ;;  %v298_v48 = vld [vmem:[%s1138_s2 + $0x70] sm:$0xff]  ;;  %v59_v50 = vld [vmem:[%s1137_s0 + $0x18] sm:$0xff] }
   0xd   :  { %788 = vmatpush3.bf16.msra.mxu0 %v785_v8  ;;  %816 = vmatpush3.bf16.msra.mxu1 %v813_v20  ;;  %v837_v51 = vpack.c.bf16 %v299_v49, %v298_v48  ;;  %v60_v52 = vld [vmem:[%s1137_s0 + $0x20] sm:$0xff]  ;;  %v61_v53 = vld [vmem:[%s1137_s0 + $0x28] sm:$0xff]  ;;  %v62_v54 = vld [vmem:[%s1137_s0 + $0x30] sm:$0xff] }
   0xe   :  { %790 = vmatprep.subr.bf16.mxu0 %v789_v12  ;;  %818 = vmatprep.subr.bf16.mxu1 %v817_v26  ;;  %v63_v55 = vld [vmem:[%s1137_s0 + $0x38] sm:$0xff]  ;;  %v64_v56 = vld [vmem:[%s1137_s0 + $0x40] sm:$0xff]  ;;  %v65_v57 = vld [vmem:[%s1137_s0 + $0x48] sm:$0xff] }
   0xf   :  { %v66_v58 = vld [vmem:[%s1137_s0 + $0x50] sm:$0xff]  ;;  %v67_v59 = vld [vmem:[%s1137_s0 + $0x58] sm:$0xff]  ;;  %v68_v60 = vld [vmem:[%s1137_s0 + $0x60] sm:$0xff] }
  0x10   :  { %v69_v61 = vld [vmem:[%s1137_s0 + $0x68] sm:$0xff]  ;;  %v70_v62 = vld [vmem:[%s1137_s0 + $0x70] sm:$0xff]  ;;  %v71_v63 = vld [vmem:[%s1137_s0 + $0x78] sm:$0xff] }
  0x11   :  { %792 = vmatpush3.bf16.msra.mxu0 %v789_v12  ;;  %820 = vmatpush3.bf16.msra.mxu1 %v817_v26  ;;  %v447_v1 = vld [vmem:[%s1139_s4 + $0x10] sm:$0xff]  ;;  %v445_v2 = vld [vmem:[%s1139_s4] sm:$0xff]  ;;  %v448_v3 = vld [vmem:[%s1139_s4 + $0x18] sm:$0xff] }
  0x12   :  { %794 = vmatprep.subr.bf16.mxu0 %v793_v21  ;;  %822 = vmatprep.subr.bf16.mxu1 %v821_v32  ;;  %v446_v4 = vld [vmem:[%s1139_s4 + $0x8] sm:$0xff]  ;;  %v449_v6 = vld [vmem:[%s1139_s4 + $0x20] sm:$0xff]  ;;  %v452_v7 = vld [vmem:[%s1139_s4 + $0x38] sm:$0xff] }
  0x13   :  { %473 = vperm.xlu1 %843, %v447_v1   ;;  %463 = vperm.xlu0 %842, %v445_v2   ;;  %v450_v5 = vld [vmem:[%s1139_s4 + $0x28] sm:$0xff]  ;;  %v451_v8 = vld [vmem:[%s1139_s4 + $0x30] sm:$0xff]  ;;  %v453_v10 = vld [vmem:[%s1139_s4 + $0x40] sm:$0xff] }
  0x14   :  { %v454_v9 = vld [vmem:[%s1139_s4 + $0x48] sm:$0xff]  ;;  %v456_v11 = vld [vmem:[%s1139_s4 + $0x58] sm:$0xff]  ;;  %v455_v12 = vld [vmem:[%s1139_s4 + $0x50] sm:$0xff] }
  0x15   :  { %796 = vmatpush3.bf16.msra.mxu0 %v793_v21  ;;  %824 = vmatpush3.bf16.msra.mxu1 %v821_v32  ;;  %v458_v13 = vld [vmem:[%s1139_s4 + $0x68] sm:$0xff]  ;;  %v457_v14 = vld [vmem:[%s1139_s4 + $0x60] sm:$0xff]  ;;  %v460_v15 = vld [vmem:[%s1139_s4 + $0x78] sm:$0xff] }
  0x16   :  { %798 = vmatprep.subr.bf16.mxu0 %v797_v27  ;;  %826 = vmatprep.subr.bf16.mxu1 %v825_v38  ;;  %v459_v16 = vld [vmem:[%s1139_s4 + $0x70] sm:$0xff]  ;;  %v1070_v40 = vld [vmem:[%s1140_s3] ss:$0 sm:$0xff] }
  0x17   :  { %478 = vperm.xlu1 %843, %v448_v3   ;;  %468 = vperm.xlu0 %842, %v446_v4  }
  0x19   :  { %800 = vmatpush3.bf16.msra.mxu0 %v797_v27  ;;  %828 = vmatpush3.bf16.msra.mxu1 %v825_v38 }
  0x1a   :  { %802 = vmatprep.subr.bf16.mxu0 %v801_v33  ;;  %830 = vmatprep.subr.bf16.mxu1 %v829_v42 }
  0x1b   :  { %488 = vperm.xlu1 %843, %v450_v5   ;;  %483 = vperm.xlu0 %842, %v449_v6  }
  0x1d   :  { %804 = vmatpush3.bf16.msra.mxu0 %v801_v33  ;;  %832 = vmatpush3.bf16.msra.mxu1 %v829_v42 }
  0x1e   :  { %806 = vmatprep.subr.bf16.mxu0 %v805_v39  ;;  %834 = vmatprep.subr.bf16.mxu1 %v833_v46 }
  0x1f   :  { %498 = vperm.xlu1 %843, %v452_v7   ;;  %493 = vperm.xlu0 %842, %v451_v8  }
  0x21   :  { %808 = vmatpush3.bf16.msra.mxu0 %v805_v39  ;;  %836 = vmatpush3.bf16.msra.mxu1 %v833_v46 }
  0x22   :  { %838 = vmatprep.subr.bf16.mxu1 %v837_v51 }
  0x23   :  { %508 = vperm.xlu1 %843, %v454_v9   ;;  %503 = vperm.xlu0 %842, %v453_v10  }
  0x24   :  { %698 = vmatmul.mubr.f32.vlgmr.msra.gmra.mrb[0].mxu0 %v57_v45 }
  0x25   :  { %700 = vmatprep.mubr.f32.mxu0 %v58_v47  ;;  %840 = vmatpush3.bf16.msra.mxu1 %v837_v51 }
  0x27   :  { %518 = vperm.xlu1 %843, %v456_v11   ;;  %513 = vperm.xlu0 %842, %v455_v12  }
  0x28   :  { %701 = vmatmul.mubr.f32.gmra.mrb[2].mxu0 %v59_v50 }
  0x29   :  { %703 = vmatprep.mubr.f32.mxu0 %v60_v52 }
  0x2b   :  { %528 = vperm.xlu1 %843, %v458_v13   ;;  %523 = vperm.xlu0 %842, %v457_v14  }
  0x2c   :  { %704 = vmatmul.mubr.f32.gmra.mrb[4].mxu0 %v61_v53 }
  0x2d   :  { %706 = vmatprep.mubr.f32.mxu0 %v62_v54 }
  0x2f   :  { %538 = vperm.xlu1 %843, %v460_v15   ;;  %533 = vperm.xlu0 %842, %v459_v16  }
  0x30   :  { %707 = vmatmul.mubr.f32.gmra.mrb[6].mxu0 %v63_v55 }
  0x31   :  { %709 = vmatprep.mubr.f32.mxu0 %v64_v56 }
  0x34   :  { %710 = vmatmul.mubr.f32.gmra.mrb[8].mxu0 %v65_v57 }
  0x35   :  { %712 = vmatprep.mubr.f32.mxu0 %v66_v58 }
  0x38   :  { %713 = vmatmul.mubr.f32.gmra.mrb[10].mxu0 %v67_v59 }
  0x39   :  { %715 = vmatprep.mubr.f32.mxu0 %v68_v60 }
  0x3c   :  { %716 = vmatmul.mubr.f32.gmra.mrb[12].mxu0 %v69_v61 }
  0x3d   :  { %718 = vmatprep.mubr.f32.mxu0 %v70_v62 }
  0x40   :  { %719 = vmatmul.mubr.f32.gmra.mrb[14].mxu0 %v71_v63 }
  0x92   :  { %v474_v33 = vpop.permute.xlu1 %473  ;;  %v464_v34 = vpop.permute.xlu0 %463 }
  0x96   :  { %v479_v35 = vpop.permute.xlu1 %478  ;;  %v469_v36 = vpop.permute.xlu0 %468 }
  0x9a   :  { %v489_v37 = vpop.permute.xlu1 %488  ;;  %v484_v38 = vpop.permute.xlu0 %483 }
  0x9e   :  { %v499_v45 = vpop.permute.xlu1 %498  ;;  %v494_v48 = vpop.permute.xlu0 %493 }
  0xa2   :  { %v509_v57 = vpop.permute.xlu1 %508  ;;  %v504_v59 = vpop.permute.xlu0 %503 }
  0xa6   :  { %v519_v3 = vpop.permute.xlu1 %518  ;;  %v514_v6 = vpop.permute.xlu0 %513 }
  0xaa   :  { %v529_v15 = vpop.permute.xlu1 %528 }
  0xf7   :  { %v699_v17 = vpop.f32.mrb[0].mxu0 }
  0xf8   :  { %v154_v18 = vpop.f32.mrb[1].mxu0 }
  0xf9   :  { %753 = vmatprep.mubr.f32.mxu1 %v154_v18 }
  0xfa   :  { %754 = vmatmul.mubr.f32.vlgmr.msra.gmra.mrb[0].mxu1 %v699_v17  ;;  %v524_v17 = vpop.permute.xlu0 %523 }
  0xfb   :  { %v702_v19 = vpop.f32.mrb[2].mxu0 }
  0xfc   :  { %v164_v20 = vpop.f32.mrb[3].mxu0 }
  0xfd   :  { %756 = vmatprep.mubr.f32.mxu1 %v164_v20 }
  0xfe   :  { %757 = vmatmul.mubr.f32.gmra.mrb[2].mxu1 %v702_v19 }
  0xff   :  { %v705_v21 = vpop.f32.mrb[4].mxu0 }
 0x100   :  { %v174_v22 = vpop.f32.mrb[5].mxu0 }
 0x101   :  { %759 = vmatprep.mubr.f32.mxu1 %v174_v22 }
 0x102   :  { %760 = vmatmul.mubr.f32.gmra.mrb[4].mxu1 %v705_v21 }
 0x103   :  { %v708_v23 = vpop.f32.mrb[6].mxu0 }
 0x104   :  { %v184_v24 = vpop.f32.mrb[7].mxu0 }
 0x105   :  { %762 = vmatprep.mubr.f32.mxu1 %v184_v24 }
 0x106   :  { %763 = vmatmul.mubr.f32.gmra.mrb[6].mxu1 %v708_v23 }
 0x107   :  { %v711_v25 = vpop.f32.mrb[8].mxu0 }
 0x108   :  { %v194_v26 = vpop.f32.mrb[9].mxu0 }
 0x109   :  { %765 = vmatprep.mubr.f32.mxu1 %v194_v26 }
 0x10a   :  { %766 = vmatmul.mubr.f32.gmra.mrb[8].mxu1 %v711_v25  ;;  %v539_v25 = vpop.permute.xlu1 %538 }
 0x10b   :  { %v714_v27 = vpop.f32.mrb[10].mxu0 }
 0x10c   :  { %v204_v28 = vpop.f32.mrb[11].mxu0 }
 0x10d   :  { %768 = vmatprep.mubr.f32.mxu1 %v204_v28  ;;  %v534_v28 = vpop.permute.xlu0 %533 }
 0x10e   :  { %769 = vmatmul.mubr.f32.gmra.mrb[10].mxu1 %v714_v27 }
 0x10f   :  { %v717_v29 = vpop.f32.mrb[12].mxu0 }
 0x110   :  { %v214_v30 = vpop.f32.mrb[13].mxu0 }
 0x111   :  { %771 = vmatprep.mubr.f32.mxu1 %v214_v30 }
 0x112   :  { %772 = vmatmul.mubr.f32.gmra.mrb[12].mxu1 %v717_v29 }
 0x113   :  { %v720_v31 = vpop.f32.mrb[14].mxu0 }
 0x114   :  { %v224_v32 = vpop.f32.mrb[15].mxu0 }
 0x115   :  { %774 = vmatprep.mubr.f32.mxu1 %v224_v32 }
 0x116   :  { %775 = vmatmul.mubr.f32.gmra.mrb[14].mxu1 %v720_v31 }
 0x1cd   :  { %v755_v39 = vpop.f32.mrb[0].mxu1 }
 0x1ce   :  { %v542_v41 = vmul.f32 %v755_v39, %v469_v36  ;;  %v366_v42 = vpop.f32.mrb[1].mxu1 }
 0x1cf   :  { %v541_v43 = vmul.f32 %v464_v34, %v366_v42 }
 0x1d0   :  { %v565_v44 = vadd.f32 %v1070_v40, %v542_v41 }
 0x1d1   :  { %v564_v46 = vadd.f32 %v1070_v40, %v541_v43  ;;  %v758_v47 = vpop.f32.mrb[2].mxu1 }
 0x1d2   :  { %581 = vst [vmem:[%s1141_s5 + $0x8] sm:$0xff] %v565_v44  ;;  %v544_v49 = vmul.f32 %v758_v47, %v479_v35  ;;  %v376_v50 = vpop.f32.mrb[3].mxu1 }
 0x1d3   :  { %580 = vst [vmem:[%s1141_s5] sm:$0xff] %v564_v46  ;;  %v543_v51 = vmul.f32 %v474_v33, %v376_v50 }
 0x1d4   :  { %v567_v52 = vadd.f32 %v1070_v40, %v544_v49 }
 0x1d5   :  { %v566_v53 = vadd.f32 %v1070_v40, %v543_v51  ;;  %v761_v54 = vpop.f32.mrb[4].mxu1 }
 0x1d6   :  { %583 = vst [vmem:[%s1141_s5 + $0x18] sm:$0xff] %v567_v52  ;;  %v546_v55 = vmul.f32 %v761_v54, %v489_v37  ;;  %v386_v56 = vpop.f32.mrb[5].mxu1 }
 0x1d7   :  { %582 = vst [vmem:[%s1141_s5 + $0x10] sm:$0xff] %v566_v53  ;;  %v545_v58 = vmul.f32 %v484_v38, %v386_v56 }
 0x1d8   :  { %v569_v60 = vadd.f32 %v1070_v40, %v546_v55 }
 0x1d9   :  { %v568_v61 = vadd.f32 %v1070_v40, %v545_v58  ;;  %v764_v62 = vpop.f32.mrb[6].mxu1 }
 0x1da   :  { %585 = vst [vmem:[%s1141_s5 + $0x28] sm:$0xff] %v569_v60  ;;  %v548_v63 = vmul.f32 %v764_v62, %v499_v45  ;;  %v396_v0 = vpop.f32.mrb[7].mxu1 }
 0x1db   :  { %584 = vst [vmem:[%s1141_s5 + $0x20] sm:$0xff] %v568_v61  ;;  %v547_v1 = vmul.f32 %v494_v48, %v396_v0 }
 0x1dc   :  { %v571_v2 = vadd.f32 %v1070_v40, %v548_v63 }
 0x1dd   :  { %v570_v4 = vadd.f32 %v1070_v40, %v547_v1  ;;  %v767_v5 = vpop.f32.mrb[8].mxu1 }
 0x1de   :  { %587 = vst [vmem:[%s1141_s5 + $0x38] sm:$0xff] %v571_v2  ;;  %v550_v7 = vmul.f32 %v767_v5, %v509_v57  ;;  %v406_v8 = vpop.f32.mrb[9].mxu1 }
 0x1df   :  { %586 = vst [vmem:[%s1141_s5 + $0x30] sm:$0xff] %v570_v4  ;;  %v549_v9 = vmul.f32 %v504_v59, %v406_v8 }
 0x1e0   :  { %v573_v10 = vadd.f32 %v1070_v40, %v550_v7 }
 0x1e1   :  { %v572_v11 = vadd.f32 %v1070_v40, %v549_v9  ;;  %v770_v12 = vpop.f32.mrb[10].mxu1 }
 0x1e2   :  { %589 = vst [vmem:[%s1141_s5 + $0x48] sm:$0xff] %v573_v10  ;;  %v552_v13 = vmul.f32 %v770_v12, %v519_v3  ;;  %v416_v14 = vpop.f32.mrb[11].mxu1 }
 0x1e3   :  { %588 = vst [vmem:[%s1141_s5 + $0x40] sm:$0xff] %v572_v11  ;;  %v551_v16 = vmul.f32 %v514_v6, %v416_v14 }
 0x1e4   :  { %v575_v18 = vadd.f32 %v1070_v40, %v552_v13 }
 0x1e5   :  { %v574_v19 = vadd.f32 %v1070_v40, %v551_v16  ;;  %v773_v20 = vpop.f32.mrb[12].mxu1 }
 0x1e6   :  { %591 = vst [vmem:[%s1141_s5 + $0x58] sm:$0xff] %v575_v18  ;;  %v554_v21 = vmul.f32 %v773_v20, %v529_v15  ;;  %v426_v22 = vpop.f32.mrb[13].mxu1 }
 0x1e7   :  { %590 = vst [vmem:[%s1141_s5 + $0x50] sm:$0xff] %v574_v19  ;;  %v553_v23 = vmul.f32 %v524_v17, %v426_v22 }
 0x1e8   :  { %v577_v24 = vadd.f32 %v1070_v40, %v554_v21 }
 0x1e9   :  { %v576_v26 = vadd.f32 %v1070_v40, %v553_v23  ;;  %v776_v27 = vpop.f32.mrb[14].mxu1 }
 0x1ea   :  { %593 = vst [vmem:[%s1141_s5 + $0x68] sm:$0xff] %v577_v24  ;;  %v556_v29 = vmul.f32 %v776_v27, %v539_v25  ;;  %v436_v30 = vpop.f32.mrb[15].mxu1 }
 0x1eb   :  { %592 = vst [vmem:[%s1141_s5 + $0x60] sm:$0xff] %v576_v26  ;;  %v555_v31 = vmul.f32 %v534_v28, %v436_v30 }
 0x1ec   :  { %v579_v32 = vadd.f32 %v1070_v40, %v556_v29 }
 0x1ed   :  { %v578_v33 = vadd.f32 %v1070_v40, %v555_v31 }
 0x1ee   :  { %595 = vst [vmem:[%s1141_s5 + $0x78] sm:$0xff] %v579_v32 }
 0x1ef   :  { %594 = vst [vmem:[%s1141_s5 + $0x70] sm:$0xff] %v578_v33 }

</bundles_post_ra>
